<compile_context>
chip_gen: v5e
topology: v5e:2x2
jax: 0.10.0
libtpu: 0.0.40
codegen_flags: <defaults>
</compile_context>

<pallas_src>
import jax
import jax.numpy as jnp
from jax.experimental import pallas as pl
from jax.experimental.pallas import tpu as pltpu

# Defaults from DiffusionBackbone.__init__ (c_* are constant functions of t).
C_SKIP = 0.0
C_OUT = 1.0
C_IN = 1.0
C_NOISE = 1.0  # only used when pass_t_to_x_0_predictor=True (not the case here)


def diffusion_backbone_kernel(xt_ref, t_ref, w1_ref, b1_ref, wt_ref, bt_ref,
                              w2x_ref, w2t_ref, b2_ref, out_ref):
    """Whole problem resident in VMEM; one kernel invocation.

    xt_ref  : [B_pad, D]    bf16 flattened x_t (batch zero-padded to a sublane multiple)
    t_ref   : [B_pad, 1]    f32 time steps
    w1/b1   : [D, HID], [1, HID]   bf16 x_t_encoder linear (HID unpadded)
    wt/bt   : [1, HID], [1, HID]   bf16 t_encoder linear
    w2x/w2t : [HID, D] each        bf16 halves of the x_0_predictor weight
    b2      : [1, D]               bf16 predictor bias
    out_ref : [B_pad, D]    f32 output
    """
    f32 = jnp.float32

    # x_t encoder: Linear(D, HID) + ReLU  (bf16 MXU matmul, f32 accumulation).
    xe = jnp.dot(xt_ref[...], w1_ref[...], preferred_element_type=f32)
    xe = jnp.maximum(xe + b1_ref[...].astype(f32), 0.0)          # [B_pad, HID]

    # t encoder: Linear(1, HID) + ReLU expressed as a VPU broadcast (K=1).
    te = jnp.maximum(t_ref[...] * wt_ref[...].astype(f32)
                     + bt_ref[...].astype(f32), 0.0)             # [B_pad, HID]

    if C_IN != 1.0:  # Python-level constant fold (module default c_in = 1)
        xe = C_IN * xe

    # x_0_predictor over concat([xe, te]) == two dots against the two weight halves
    # (avoids the lane-concat relayout and the zero-padded K rows of a stacked weight).
    x_out = jnp.dot(xe.astype(jnp.bfloat16), w2x_ref[...], preferred_element_type=f32)
    x_out = x_out + jnp.dot(te.astype(jnp.bfloat16), w2t_ref[...],
                            preferred_element_type=f32)
    x_out = x_out + b2_ref[...].astype(f32)                      # [B_pad, D]

    # x_0_pred = c_skip(t) * x_t + c_out(t) * x_out ; module defaults fold this to identity.
    if C_OUT != 1.0:
        x_out = C_OUT * x_out
    if C_SKIP != 0.0:
        x_out = x_out + C_SKIP * xt_ref[...].astype(f32)

    out_ref[...] = x_out


@jax.jit
def diffusion_backbone(x_t, t, packed):
    """Flatten NCHW, pad batch to 8 sublanes, run the fused single-step kernel, reshape back."""
    B, C, H, W = x_t.shape
    D = C * H * W
    HID = packed["w1"].shape[1]

    # Pad batch to a multiple of 8 sublanes (unmasked stores / full MXU rows).
    B_pad = ((B + 7) // 8) * 8
    x_flat = x_t.reshape(B, D).astype(jnp.bfloat16)
    x_pad = jnp.zeros((B_pad, D), jnp.bfloat16).at[:B].set(x_flat)
    t_pad = jnp.zeros((B_pad, 1), jnp.float32).at[:B].set(t.astype(jnp.float32))

    flops = 2 * B_pad * D * HID + 2 * (2 * B_pad * HID * D)
    bytes_accessed = (
        x_pad.size * 2 + t_pad.size * 4
        + packed["w1"].size * 2 + packed["b1"].size * 2
        + packed["wt"].size * 2 + packed["bt"].size * 2
        + packed["w2x"].size * 2 + packed["w2t"].size * 2
        + packed["b2"].size * 2
        + B_pad * D * 4                          # f32 output writeback
    )

    vmem = pl.BlockSpec(memory_space=pltpu.MemorySpace.VMEM)
    out_pad = pl.pallas_call(
        diffusion_backbone_kernel,
        out_shape=jax.ShapeDtypeStruct((B_pad, D), jnp.float32),
        in_specs=[vmem] * 9,
        out_specs=vmem,
        cost_estimate=pl.CostEstimate(
            flops=int(flops), transcendentals=0, bytes_accessed=int(bytes_accessed)),
    )(x_pad, t_pad, packed["w1"], packed["b1"], packed["wt"], packed["bt"],
      packed["w2x"], packed["w2t"], packed["b2"])

    return out_pad[:B].reshape(B, C, H, W)


def pack_params(params):
    """Cast everything to bf16; no HID padding, no weight stacking."""
    bf = jnp.bfloat16
    return {
        "w1": params["w1"].astype(bf), "b1": params["b1"].astype(bf),
        "wt": params["wt"].astype(bf), "bt": params["bt"].astype(bf),
        "w2x": params["w2x"].astype(bf), "w2t": params["w2t"].astype(bf),
        "b2": params["b2"].astype(bf),
    }


def reference(x_t, t, params):
    """Pure-JAX reference with the same bf16 weight/activation quantization."""
    f32 = jnp.float32
    q = lambda a: a.astype(jnp.bfloat16).astype(f32)
    hi = jax.lax.Precision.HIGHEST
    B = x_t.shape[0]
    x = q(x_t.reshape(B, -1).astype(f32))
    xe = jax.nn.relu(jnp.dot(x, q(params["w1"]), precision=hi) + q(params["b1"]))
    te = jax.nn.relu(t.astype(f32) * q(params["wt"]) + q(params["bt"]))
    h = q(jnp.concatenate([C_IN * xe, te], axis=-1))
    w2 = jnp.concatenate([params["w2x"], params["w2t"]], axis=0)
    x_out = jnp.dot(h, q(w2), precision=hi) + q(params["b2"])
    out = C_SKIP * x + C_OUT * x_out
    return out.reshape(x_t.shape)


def init_params(key, d_in, hid):
    """Deterministic synthetic parameter init (Kaiming-ish scaling), model shapes."""
    ks = jax.random.split(key, 6)
    return {
        "w1":  jax.random.normal(ks[0], (d_in, hid), jnp.float32) * (1.0 / jnp.sqrt(d_in)),
        "b1":  jnp.zeros((1, hid), jnp.float32),
        "wt":  jax.random.normal(ks[1], (1, hid), jnp.float32),
        "bt":  jnp.full((1, hid), 0.1, jnp.float32),
        "w2x": jax.random.normal(ks[2], (hid, d_in), jnp.float32) * (1.0 / jnp.sqrt(2 * hid)),
        "w2t": jax.random.normal(ks[3], (hid, d_in), jnp.float32) * (1.0 / jnp.sqrt(2 * hid)),
        "b2":  jnp.zeros((1, d_in), jnp.float32),
    }


if __name__ == "__main__":
    B, C, H, W = 2, 4, 16, 16      # x_t: [batch, channels, spatial, spatial]
    HID = 32                       # embedding width (kept unpadded inside the kernel)
    D = C * H * W

    key = jax.random.PRNGKey(0)
    k_x, k_t, k_p = jax.random.split(key, 3)

    x_t = jax.random.normal(k_x, (B, C, H, W), jnp.float32)
    t = jax.random.uniform(k_t, (B, 1), jnp.float32)      # time steps, shape [B, 1]
    params = init_params(k_p, D, HID)
    packed = pack_params(params)

    x_0_pred = diffusion_backbone(x_t, t, packed)
    x_0_pred = jax.block_until_ready(x_0_pred)

    ref = reference(x_t, t, params)
    assert x_0_pred.shape == (B, C, H, W)
    # bf16 weights/activations on both sides; residual difference is f32 accumulation order.
    assert jnp.allclose(x_0_pred, ref, rtol=1e-2, atol=1e-2), (
        float(jnp.max(jnp.abs(x_0_pred - ref))))

    print("KERNEL_OK")
</pallas_src>

<mosaic_0001>
module attributes {stable_mosaic.version = 11 : i64} {
  func.func @diffusion_backbone_kernel(%arg0: memref<8x1024xbf16, #tpu.memory_space<vmem>>, %arg1: memref<8x1xf32, #tpu.memory_space<vmem>>, %arg2: memref<1024x32xbf16, #tpu.memory_space<vmem>>, %arg3: memref<1x32xbf16, #tpu.memory_space<vmem>>, %arg4: memref<1x32xbf16, #tpu.memory_space<vmem>>, %arg5: memref<1x32xbf16, #tpu.memory_space<vmem>>, %arg6: memref<32x1024xbf16, #tpu.memory_space<vmem>>, %arg7: memref<32x1024xbf16, #tpu.memory_space<vmem>>, %arg8: memref<1x1024xbf16, #tpu.memory_space<vmem>>, %arg9: memref<8x1024xf32, #tpu.memory_space<vmem>>) attributes {dimension_semantics = [], scalar_prefetch = 0 : i64, scratch_operands = 0 : i64, tpu.core_type = #tpu.core_type<tc>} {
    %c0 = arith.constant 0 : index
    %c0_0 = arith.constant 0 : index
    %0 = vector.load %arg0[%c0, %c0_0] : memref<8x1024xbf16, #tpu.memory_space<vmem>>, vector<8x1024xbf16>
    %c0_1 = arith.constant 0 : index
    %c0_2 = arith.constant 0 : index
    %1 = vector.load %arg2[%c0_1, %c0_2] : memref<1024x32xbf16, #tpu.memory_space<vmem>>, vector<1024x32xbf16>
    %cst = arith.constant dense<0.000000e+00> : vector<8x32xf32>
    %2 = tpu.matmul %0, %1, %cst {dimension_numbers = #tpu.dot_dimension_numbers<[1], [0], [0], [1], [0, 0, 1, 1], [], []>} : vector<8x1024xbf16>, vector<1024x32xbf16>, vector<8x32xf32> -> vector<8x32xf32>
    %c0_3 = arith.constant 0 : index
    %c0_4 = arith.constant 0 : index
    %3 = vector.load %arg3[%c0_3, %c0_4] : memref<1x32xbf16, #tpu.memory_space<vmem>>, vector<1x32xbf16>
    %4 = arith.extf %3 : vector<1x32xbf16> to vector<1x32xf32>
    %5 = vector.broadcast %4 : vector<1x32xf32> to vector<8x32xf32>
    %6 = arith.addf %2, %5 : vector<8x32xf32>
    %cst_5 = arith.constant 0.000000e+00 : f32
    %7 = vector.broadcast %cst_5 : f32 to vector<8x32xf32>
    %8 = arith.maximumf %6, %7 : vector<8x32xf32>
    %c0_6 = arith.constant 0 : index
    %c0_7 = arith.constant 0 : index
    %9 = vector.load %arg1[%c0_6, %c0_7] : memref<8x1xf32, #tpu.memory_space<vmem>>, vector<8x1xf32>
    %c0_8 = arith.constant 0 : index
    %c0_9 = arith.constant 0 : index
    %10 = vector.load %arg4[%c0_8, %c0_9] : memref<1x32xbf16, #tpu.memory_space<vmem>>, vector<1x32xbf16>
    %11 = arith.extf %10 : vector<1x32xbf16> to vector<1x32xf32>
    %12 = vector.broadcast %9 : vector<8x1xf32> to vector<8x32xf32>
    %13 = vector.broadcast %11 : vector<1x32xf32> to vector<8x32xf32>
    %14 = arith.mulf %12, %13 : vector<8x32xf32>
    %c0_10 = arith.constant 0 : index
    %c0_11 = arith.constant 0 : index
    %15 = vector.load %arg5[%c0_10, %c0_11] : memref<1x32xbf16, #tpu.memory_space<vmem>>, vector<1x32xbf16>
    %16 = arith.extf %15 : vector<1x32xbf16> to vector<1x32xf32>
    %17 = vector.broadcast %16 : vector<1x32xf32> to vector<8x32xf32>
    %18 = arith.addf %14, %17 : vector<8x32xf32>
    %cst_12 = arith.constant 0.000000e+00 : f32
    %19 = vector.broadcast %cst_12 : f32 to vector<8x32xf32>
    %20 = arith.maximumf %18, %19 : vector<8x32xf32>
    %21 = arith.truncf %8 : vector<8x32xf32> to vector<8x32xbf16>
    %c0_13 = arith.constant 0 : index
    %c0_14 = arith.constant 0 : index
    %22 = vector.load %arg6[%c0_13, %c0_14] : memref<32x1024xbf16, #tpu.memory_space<vmem>>, vector<32x1024xbf16>
    %cst_15 = arith.constant dense<0.000000e+00> : vector<8x1024xf32>
    %23 = tpu.matmul %21, %22, %cst_15 {dimension_numbers = #tpu.dot_dimension_numbers<[1], [0], [0], [1], [0, 0, 1, 1], [], []>} : vector<8x32xbf16>, vector<32x1024xbf16>, vector<8x1024xf32> -> vector<8x1024xf32>
    %24 = arith.truncf %20 : vector<8x32xf32> to vector<8x32xbf16>
    %c0_16 = arith.constant 0 : index
    %c0_17 = arith.constant 0 : index
    %25 = vector.load %arg7[%c0_16, %c0_17] : memref<32x1024xbf16, #tpu.memory_space<vmem>>, vector<32x1024xbf16>
    %cst_18 = arith.constant dense<0.000000e+00> : vector<8x1024xf32>
    %26 = tpu.matmul %24, %25, %cst_18 {dimension_numbers = #tpu.dot_dimension_numbers<[1], [0], [0], [1], [0, 0, 1, 1], [], []>} : vector<8x32xbf16>, vector<32x1024xbf16>, vector<8x1024xf32> -> vector<8x1024xf32>
    %27 = arith.addf %23, %26 : vector<8x1024xf32>
    %c0_19 = arith.constant 0 : index
    %c0_20 = arith.constant 0 : index
    %28 = vector.load %arg8[%c0_19, %c0_20] : memref<1x1024xbf16, #tpu.memory_space<vmem>>, vector<1x1024xbf16>
    %29 = arith.extf %28 : vector<1x1024xbf16> to vector<1x1024xf32>
    %30 = vector.broadcast %29 : vector<1x1024xf32> to vector<8x1024xf32>
    %31 = arith.addf %27, %30 : vector<8x1024xf32>
    %c0_21 = arith.constant 0 : index
    %c0_22 = arith.constant 0 : index
    %32 = vector.load %arg9[%c0_21, %c0_22] : memref<8x1024xf32, #tpu.memory_space<vmem>>, vector<8x1024xf32>
    tpu.vector_store %arg9[%c0_21, %c0_22], %31 {strides = array<i32>} : memref<8x1024xf32, #tpu.memory_space<vmem>>, vector<8x1024xf32>,
    return
  }
}

</mosaic_0001>

<bundles_post_ra>
// kernel: diffusion_backbone.1
= control target key start
LH: loop header
LB: loop body
LE: loop exit
PB: predicated region body
PF: predicated region fallthrough
CT: control target
= control target key end

     0   :  { %v1656_v3 = vmov 0   ;;  %vm814_vm0 = vcmask 261120   ;;  %s2158_s2 = inlined_call_operand.vmem [shape: bf16[1024,32], index: 2, kind: input, shape index: {}]   ;;  %s2159_s1 = inlined_call_operand.vmem [shape: f32[8,1], index: 1, kind: input, shape index: {}]   ;;  %s2160_s0 = inlined_call_operand.vmem [shape: bf16[8,1024], index: 0, kind: input, shape index: {}]   ;;  %s2161_s7 = inlined_call_operand.vmem [shape: bf16[32,1024], index: 7, kind: input, shape index: {}]   ;;  %s2162_s4 = inlined_call_operand.vmem [shape: bf16[1,32], index: 4, kind: input, shape index: {}]   ;;  %s2163_s5 = inlined_call_operand.vmem [shape: bf16[1,32], index: 5, kind: input, shape index: {}]   ;;  %s2164_s6 = inlined_call_operand.vmem [shape: bf16[32,1024], index: 6, kind: input, shape index: {}]   ;;  %s2165_s3 = inlined_call_operand.vmem [shape: bf16[1,32], index: 3, kind: input, shape index: {}]   ;;  %s2166_s8 = inlined_call_operand.vmem [shape: bf16[1,1024], index: 8, kind: input, shape index: {}]   ;;  %s2167_s9 = inlined_call_operand.vmem [shape: f32[8,1024], index: 9, kind: output, shape index: {}]  }
   0x1   :  { %v1565_v0 = vld [vmem:[%s2158_s2 + $0x38] sm:$0xff]  ;;  %1655 = vset.pattern.permute.xlu0 %v1656_v3  ;;  %v1564_v5 = vld [vmem:[%s2158_s2 + $0x30] sm:$0xff]  ;;  %v1563_v9 = vld [vmem:[%s2158_s2 + $0x28] sm:$0xff] }
   0x2   :  { %v1573_v1 = vld [vmem:[%s2158_s2 + $0x78] sm:$0xff]  ;;  %580 = vmatpush.bf16.msra.mxu0 %v1565_v0  ;;  %v1572_v6 = vld [vmem:[%s2158_s2 + $0x70] sm:$0xff]  ;;  %v1571_v10 = vld [vmem:[%s2158_s2 + $0x68] sm:$0xff] }
   0x3   :  { %v1581_v2 = vld [vmem:[%s2158_s2 + $0xb8] sm:$0xff]  ;;  %593 = vmatpush.bf16.msra.mxu1 %v1573_v1  ;;  %v1580_v7 = vld [vmem:[%s2158_s2 + $0xb0] sm:$0xff]  ;;  %v1579_v11 = vld [vmem:[%s2158_s2 + $0xa8] sm:$0xff] }
   0x4   :  { %v1589_v4 = vld [vmem:[%s2158_s2 + $0xf8] sm:$0xff]  ;;  %606 = vmatpush.bf16.msra.mxu2 %v1581_v2  ;;  %v1588_v8 = vld [vmem:[%s2158_s2 + $0xf0] sm:$0xff]  ;;  %v1587_v12 = vld [vmem:[%s2158_s2 + $0xe8] sm:$0xff] }
   0x5   :  { %619 = vmatpush.bf16.msra.mxu3 %v1589_v4  ;;  %v685_v13 = vld [vmem:[%s2159_s1] sm:$0xff]  ;;  %v1561_v18 = vld [vmem:[%s2158_s2 + $0x18] sm:$0xff]  ;;  %v1560_v22 = vld [vmem:[%s2158_s2 + $0x10] sm:$0xff] }
   0x6   :  { %581 = vmatpush.bf16.msra.mxu0 %v1564_v5  ;;  %690 = vperm.xlu0 %1655, %v685_v13   ;;  %v1562_v14 = vld [vmem:[%s2158_s2 + $0x20] sm:$0xff]  ;;  %v1569_v19 = vld [vmem:[%s2158_s2 + $0x58] sm:$0xff]  ;;  %v1568_v23 = vld [vmem:[%s2158_s2 + $0x50] sm:$0xff] }
   0x7   :  { %594 = vmatpush.bf16.msra.mxu1 %v1572_v6  ;;  %v1570_v15 = vld [vmem:[%s2158_s2 + $0x60] sm:$0xff]  ;;  %v1577_v20 = vld [vmem:[%s2158_s2 + $0x98] sm:$0xff]  ;;  %v1576_v24 = vld [vmem:[%s2158_s2 + $0x90] sm:$0xff] }
   0x8   :  { %607 = vmatpush.bf16.msra.mxu2 %v1580_v7  ;;  %v1578_v16 = vld [vmem:[%s2158_s2 + $0xa0] sm:$0xff]  ;;  %v1585_v21 = vld [vmem:[%s2158_s2 + $0xd8] sm:$0xff]  ;;  %v1584_v25 = vld [vmem:[%s2158_s2 + $0xd0] sm:$0xff] }
   0x9   :  { %620 = vmatpush.bf16.msra.mxu3 %v1588_v8  ;;  %v1586_v17 = vld [vmem:[%s2158_s2 + $0xe0] sm:$0xff]  ;;  %v1559_v26 = vld [vmem:[%s2158_s2 + $0x8] sm:$0xff]  ;;  %v1597_v40 = vld [vmem:[%s2158_s2 + $0x138] sm:$0xff] }
   0xa   :  { %582 = vmatpush.bf16.msra.mxu0 %v1563_v9  ;;  %v1567_v27 = vld [vmem:[%s2158_s2 + $0x48] sm:$0xff]  ;;  %v33_v31 = vld [vmem:[%s2160_s0] sm:$0xff]  ;;  %v1605_v41 = vld [vmem:[%s2158_s2 + $0x178] sm:$0xff] }
   0xb   :  { %595 = vmatpush.bf16.msra.mxu1 %v1571_v10  ;;  %v1575_v28 = vld [vmem:[%s2158_s2 + $0x88] sm:$0xff]  ;;  %v1558_v32 = vld [vmem:[%s2158_s2] sm:$0xff]  ;;  %v172_v35 = vunpack.c.l.b16 %v33_v31  ;;  %v173_v39 = vunpack.c.h.b16 %v33_v31  ;;  %v1613_v42 = vld [vmem:[%s2158_s2 + $0x1b8] sm:$0xff] }
   0xc   :  { %608 = vmatpush.bf16.msra.mxu2 %v1579_v11  ;;  %v1583_v29 = vld [vmem:[%s2158_s2 + $0xc8] sm:$0xff]  ;;  %v1566_v33 = vld [vmem:[%s2158_s2 + $0x40] sm:$0xff]  ;;  %v1621_v43 = vld [vmem:[%s2158_s2 + $0x1f8] sm:$0xff] }
   0xd   :  { %621 = vmatpush.bf16.msra.mxu3 %v1587_v12  ;;  %v34_v30 = vld [vmem:[%s2160_s0 + $0x8] sm:$0xff]  ;;  %v1574_v36 = vld [vmem:[%s2158_s2 + $0x80] sm:$0xff]  ;;  %v180_v45 = vpack.c.b16 %v172_v35, %v172_v35  ;;  %v181_v47 = vpack.c.b16 %v173_v39, %v173_v39  ;;  %v1596_v48 = vld [vmem:[%s2158_s2 + $0x130] sm:$0xff] }
   0xe   :  { %583 = vmatpush.bf16.msra.mxu0 %v1562_v14  ;;  %v174_v34 = vunpack.c.l.b16 %v34_v30  ;;  %v1582_v37 = vld [vmem:[%s2158_s2 + $0xc0] sm:$0xff]  ;;  %v175_v38 = vunpack.c.h.b16 %v34_v30  ;;  %v1604_v49 = vld [vmem:[%s2158_s2 + $0x170] sm:$0xff]  ;;  %v1595_v52 = vld [vmem:[%s2158_s2 + $0x128] sm:$0xff] }
   0xf   :  { %596 = vmatpush.bf16.msra.mxu1 %v1570_v15  ;;  %v1612_v50 = vld [vmem:[%s2158_s2 + $0x1b0] sm:$0xff]  ;;  %v1603_v53 = vld [vmem:[%s2158_s2 + $0x168] sm:$0xff]  ;;  %v1594_v56 = vld [vmem:[%s2158_s2 + $0x120] sm:$0xff] }
  0x10   :  { %609 = vmatpush.bf16.msra.mxu2 %v1578_v16  ;;  %v182_v44 = vpack.c.b16 %v174_v34, %v174_v34  ;;  %v183_v46 = vpack.c.b16 %v175_v38, %v175_v38  ;;  %v1620_v51 = vld [vmem:[%s2158_s2 + $0x1f0] sm:$0xff]  ;;  %v1611_v54 = vld [vmem:[%s2158_s2 + $0x1a8] sm:$0xff]  ;;  %v1602_v57 = vld [vmem:[%s2158_s2 + $0x160] sm:$0xff] }
  0x11   :  { %622 = vmatpush.bf16.msra.mxu3 %v1586_v17  ;;  %v1619_v55 = vld [vmem:[%s2158_s2 + $0x1e8] sm:$0xff]  ;;  %v1610_v58 = vld [vmem:[%s2158_s2 + $0x1a0] sm:$0xff]  ;;  %v1593_v60 = vld [vmem:[%s2158_s2 + $0x118] sm:$0xff] }
  0x12   :  { %584 = vmatpush.bf16.msra.mxu0 %v1561_v18  ;;  %v1618_v59 = vld [vmem:[%s2158_s2 + $0x1e0] sm:$0xff]  ;;  %v1601_v61 = vld [vmem:[%s2158_s2 + $0x158] sm:$0xff]  ;;  %v1592_v0 = vld [vmem:[%s2158_s2 + $0x110] sm:$0xff] }
  0x13   :  { %597 = vmatpush.bf16.msra.mxu1 %v1569_v19  ;;  %v1609_v62 = vld [vmem:[%s2158_s2 + $0x198] sm:$0xff]  ;;  %v1600_v1 = vld [vmem:[%s2158_s2 + $0x150] sm:$0xff]  ;;  %v1591_v4 = vld [vmem:[%s2158_s2 + $0x108] sm:$0xff] }
  0x14   :  { %610 = vmatpush.bf16.msra.mxu2 %v1577_v20  ;;  %v1617_v63 = vld [vmem:[%s2158_s2 + $0x1d8] sm:$0xff]  ;;  %v1608_v2 = vld [vmem:[%s2158_s2 + $0x190] sm:$0xff]  ;;  %v1599_v5 = vld [vmem:[%s2158_s2 + $0x148] sm:$0xff] }
  0x15   :  { %623 = vmatpush.bf16.msra.mxu3 %v1585_v21  ;;  %v1616_v3 = vld [vmem:[%s2158_s2 + $0x1d0] sm:$0xff]  ;;  %v1607_v7 = vld [vmem:[%s2158_s2 + $0x188] sm:$0xff]  ;;  %v36_v9 = vld [vmem:[%s2160_s0 + $0x18] sm:$0xff] }
  0x16   :  { %585 = vmatpush.bf16.msra.mxu0 %v1560_v22  ;;  %v35_v6 = vld [vmem:[%s2160_s0 + $0x10] sm:$0xff]  ;;  %v1615_v8 = vld [vmem:[%s2158_s2 + $0x1c8] sm:$0xff]  ;;  %v1590_v12 = vld [vmem:[%s2158_s2 + $0x100] sm:$0xff]  ;;  %v178_v14 = vunpack.c.l.b16 %v36_v9  ;;  %v179_v15 = vunpack.c.h.b16 %v36_v9 }
  0x17   :  { %598 = vmatpush.bf16.msra.mxu1 %v1568_v23  ;;  %v176_v10 = vunpack.c.l.b16 %v35_v6  ;;  %v177_v11 = vunpack.c.h.b16 %v35_v6  ;;  %v1598_v13 = vld [vmem:[%s2158_s2 + $0x140] sm:$0xff]  ;;  %v1647_v31 = vld [vmem:[%s2161_s7 + $0x4c] sm:$0xf] }
  0x18   :  { %611 = vmatpush.bf16.msra.mxu2 %v1576_v24  ;;  %v1606_v16 = vld [vmem:[%s2158_s2 + $0x180] sm:$0xff]  ;;  %v186_v20 = vpack.c.b16 %v178_v14, %v178_v14  ;;  %v187_v21 = vpack.c.b16 %v179_v15, %v179_v15 }
  0x19   :  { %624 = vmatpush.bf16.msra.mxu3 %v1584_v25  ;;  %v1614_v17 = vld [vmem:[%s2158_s2 + $0x1c0] sm:$0xff]  ;;  %v184_v18 = vpack.c.b16 %v176_v10, %v176_v10  ;;  %v185_v19 = vpack.c.b16 %v177_v11, %v177_v11 }
  0x1a   :  { %586 = vmatpush.bf16.msra.mxu0 %v1559_v26  ;;  %v1448_v22 = vld [vmem:[%s2161_s7 + $0x40] sm:$0xf]  ;;  %v1646_v24 = vld [vmem:[%s2161_s7 + $0x44] sm:$0xf] }
  0x1b   :  { %599 = vmatpush.bf16.msra.mxu1 %v1567_v27  ;;  %v1650_v23 = vld [vmem:[%s2161_s7 + $0x5c] sm:$0xf0]  ;;  %v1450_v26 = vld [vmem:[%s2161_s7 + $0x60] sm:$0xf0]  ;;  %v1456_v27 = vld [vmem:[%s2161_s7 + $0x48] sm:$0xf] }
  0x1c   :  { %612 = vmatpush.bf16.msra.mxu2 %v1575_v28  ;;  %v1449_v25 = vor.u32 %v1650_v23, %v1448_v22  ;;  %v1651_v28 = vld [vmem:[%s2161_s7 + $0x64] sm:$0xf0]  ;;  %v1642_v35 = vld [vmem:[%s2161_s7 + $0x1c] sm:$0xf0] }
  0x1d   :  { %625 = vmatpush.bf16.msra.mxu3 %v1583_v29  ;;  %v1453_v29 = vor.u32 %v1646_v24, %v1450_v26  ;;  %v1457_v30 = vor.u32 %v1651_v28, %v1456_v27  ;;  %v686_v6 = vld [vmem:[%s2162_s4] sm:$0x1]  ;;  %v1630_v26 = vld [vmem:[%s2164_s6 + $0x44] sm:$0xf] }
  0x1e   :  { %587 = vmatpush.bf16.msra.mxu0 %v1558_v32  ;;  %v1458_v32 = vld [vmem:[%s2161_s7 + $0x68] sm:$0xf0]  ;;  %v1520_v24 = vld [vmem:[%s2164_s6 + $0x40] sm:$0xf] }
  0x1f   :  { %600 = vmatpush.bf16.msra.mxu1 %v1566_v33  ;;  %v1416_v33 = vld [vmem:[%s2161_s7] sm:$0xf]  ;;  %v1461_v34 = vor.u32 %v1647_v31, %v1458_v32 }
  0x20   :  { %613 = vmatpush.bf16.msra.mxu2 %v1574_v36  ;;  %v1638_v36 = vld [vmem:[%s2161_s7 + $0x4] sm:$0xf]  ;;  %v1417_v38 = vor.u32 %v1642_v35, %v1416_v33  ;;  %v165_v31 = vld [vmem:[%s2165_s3] sm:$0x1]  ;;  %v1627_v35 = vld [vmem:[%s2164_s6 + $0x24] sm:$0xf0] }
  0x21   :  { %626 = vmatpush.bf16.msra.mxu3 %v1582_v37  ;;  %588 = vmatmul.bf16.vlgmr.msra.gmra.mxu0 %v180_v45  ;;  %v1418_v37 = vld [vmem:[%s2161_s7 + $0x20] sm:$0xf0]  ;;  %v1464_v45 = vld [vmem:[%s2161_s7 + $0x50] sm:$0xf] }
  0x22   :  { %632 = vmatpush.bf16.msrb.mxu0 %v1597_v40  ;;  %601 = vmatmul.bf16.vlgmr.msra.gmra.mxu1 %v181_v47  ;;  %v1421_v39 = vor.u32 %v1638_v36, %v1418_v37  ;;  %v1424_v40 = vld [vmem:[%s2161_s7 + $0x8] sm:$0xf]  ;;  %v1652_v47 = vld [vmem:[%s2161_s7 + $0x6c] sm:$0xf0]  ;;  %v1623_v36 = vld [vmem:[%s2164_s6 + $0xc] sm:$0xf] }
  0x23   :  { %645 = vmatpush.bf16.msrb.mxu1 %v1605_v41  ;;  %614 = vmatmul.bf16.vlgmr.msra.gmra.mxu2 %v182_v44  ;;  %v1643_v41 = vld [vmem:[%s2161_s7 + $0x24] sm:$0xf0]  ;;  %v1426_v44 = vld [vmem:[%s2161_s7 + $0x28] sm:$0xf0] }
  0x24   :  { %658 = vmatpush.bf16.msrb.mxu2 %v1613_v42  ;;  %627 = vmatmul.bf16.vlgmr.msra.gmra.mxu3 %v183_v46  ;;  %v1639_v42 = vld [vmem:[%s2161_s7 + $0xc] sm:$0xf] }
  0x25   :  { %671 = vmatpush.bf16.msrb.mxu3 %v1621_v43  ;;  %v1425_v43 = vor.u32 %v1643_v41, %v1424_v40  ;;  %v1429_v46 = vor.u32 %v1639_v42, %v1426_v44  ;;  %v1488_v40 = vld [vmem:[%s2164_s6] sm:$0xf]  ;;  %v166_v42 = vunpack.c.l.bf16 %v165_v31 }
  0x26   :  { %633 = vmatpush.bf16.msrb.mxu0 %v1596_v48  ;;  %v1648_v48 = vld [vmem:[%s2161_s7 + $0x54] sm:$0xf]  ;;  %v1626_v41 = vld [vmem:[%s2164_s6 + $0x1c] sm:$0xf0] }
  0x27   :  { %646 = vmatpush.bf16.msrb.mxu1 %v1604_v49  ;;  %v1466_v49 = vld [vmem:[%s2161_s7 + $0x70] sm:$0xf0] }
  0x28   :  { %659 = vmatpush.bf16.msrb.mxu2 %v1612_v50  ;;  %v1465_v50 = vor.u32 %v1652_v47, %v1464_v45  ;;  %v1489_v45 = vor.u32 %v1626_v41, %v1488_v40  ;;  %v1490_v47 = vld [vmem:[%s2164_s6 + $0x20] sm:$0xf0] }
  0x29   :  { %672 = vmatpush.bf16.msrb.mxu3 %v1620_v51  ;;  %v1469_v51 = vor.u32 %v1648_v48, %v1466_v49  ;;  %v167_v49 = vperm.slane %v166_v42, 0 }
  0x2a   :  { %634 = vmatpush.bf16.msrb.mxu0 %v1595_v52  ;;  %v1472_v52 = vld [vmem:[%s2161_s7 + $0x58] sm:$0xf] }
  0x2b   :  { %647 = vmatpush.bf16.msrb.mxu1 %v1603_v53  ;;  %v1653_v53 = vld [vmem:[%s2161_s7 + $0x74] sm:$0xf0] }
  0x2c   :  { %660 = vmatpush.bf16.msrb.mxu2 %v1611_v54  ;;  %v1649_v54 = vld [vmem:[%s2161_s7 + $0x5c] sm:$0xf] }
  0x2d   :  { %673 = vmatpush.bf16.msrb.mxu3 %v1619_v55  ;;  %v1473_v55 = vor.u32 %v1653_v53, %v1472_v52  ;;  %v1637_v52 = vld [vmem:[%s2164_s6 + $0x74] sm:$0xf0]  ;;  %v1633_v53 = vld [vmem:[%s2164_s6 + $0x5c] sm:$0xf] }
  0x2e   :  { %635 = vmatpush.bf16.msrb.mxu0 %v1594_v56  ;;  %v1474_v56 = vld [vmem:[%s2161_s7 + $0x78] sm:$0xf0] }
  0x2f   :  { %648 = vmatpush.bf16.msrb.mxu1 %v1602_v57  ;;  %v1432_v57 = vld [vmem:[%s2161_s7 + $0x10] sm:$0xf] }
  0x30   :  { %661 = vmatpush.bf16.msrb.mxu2 %v1610_v58  ;;  %v1644_v58 = vld [vmem:[%s2161_s7 + $0x2c] sm:$0xf0] }
  0x31   :  { %674 = vmatpush.bf16.msrb.mxu3 %v1618_v59  ;;  %v1477_v59 = vor.u32 %v1649_v54, %v1474_v56  ;;  %v1546_v56 = vld [vmem:[%s2164_s6 + $0x78] sm:$0xf0] }
  0x32   :  { %636 = vmatpush.bf16.msrb.mxu0 %v1593_v60  ;;  %v1433_v60 = vor.u32 %v1644_v58, %v1432_v57  ;;  %v1536_v57 = vld [vmem:[%s2164_s6 + $0x50] sm:$0xf] }
  0x33   :  { %649 = vmatpush.bf16.msrb.mxu1 %v1601_v61  ;;  %v1640_v61 = vld [vmem:[%s2161_s7 + $0x14] sm:$0xf]  ;;  %v1636_v58 = vld [vmem:[%s2164_s6 + $0x6c] sm:$0xf0] }
  0x34   :  { %662 = vmatpush.bf16.msrb.mxu2 %v1609_v62  ;;  %v1434_v62 = vld [vmem:[%s2161_s7 + $0x30] sm:$0xf0] }
  0x35   :  { %675 = vmatpush.bf16.msrb.mxu3 %v1617_v63  ;;  %v1440_v63 = vld [vmem:[%s2161_s7 + $0x18] sm:$0xf] }
  0x36   :  { %637 = vmatpush.bf16.msrb.mxu0 %v1592_v0  ;;  %v1437_v0 = vor.u32 %v1640_v61, %v1434_v62  ;;  %v1632_v61 = vld [vmem:[%s2164_s6 + $0x54] sm:$0xf] }
  0x37   :  { %650 = vmatpush.bf16.msrb.mxu1 %v1600_v1  ;;  %v1645_v1 = vld [vmem:[%s2161_s7 + $0x34] sm:$0xf0]  ;;  %v1538_v62 = vld [vmem:[%s2164_s6 + $0x70] sm:$0xf0] }
  0x38   :  { %663 = vmatpush.bf16.msrb.mxu2 %v1608_v2  ;;  %v1641_v2 = vld [vmem:[%s2161_s7 + $0x1c] sm:$0xf] }
  0x39   :  { %676 = vmatpush.bf16.msrb.mxu3 %v1616_v3  ;;  %v1442_v3 = vld [vmem:[%s2161_s7 + $0x38] sm:$0xf0] }
  0x3a   :  { %638 = vmatpush.bf16.msrb.mxu0 %v1591_v4  ;;  %v1441_v4 = vor.u32 %v1645_v1, %v1440_v63  ;;  %v1512_v63 = vld [vmem:[%s2164_s6 + $0x18] sm:$0xf]  ;;  %v1541_v1 = vor.u32 %v1632_v61, %v1538_v62 }
  0x3b   :  { %651 = vmatpush.bf16.msrb.mxu1 %v1599_v5  ;;  %v1445_v5 = vor.u32 %v1641_v2, %v1442_v3  ;;  %v1629_v2 = vld [vmem:[%s2164_s6 + $0x34] sm:$0xf0]  ;;  %v1625_v3 = vld [vmem:[%s2164_s6 + $0x1c] sm:$0xf] }
  0x3c   :  { %664 = vmatpush.bf16.msrb.mxu2 %v1607_v7  ;;  %v695_v7 = vld [vmem:[%s2163_s5] sm:$0x1] }
  0x3d   :  { %677 = vmatpush.bf16.msrb.mxu3 %v1615_v8  ;;  %v687_v8 = vunpack.c.l.bf16 %v686_v6  ;;  %v696_v9 = vunpack.c.l.bf16 %v695_v7  ;;  %v1504_v7 = vld [vmem:[%s2164_s6 + $0x10] sm:$0xf] }
  0x3e   :  { %639 = vmatpush.bf16.msrb.mxu0 %v1590_v12 }
  0x3f   :  { %652 = vmatpush.bf16.msrb.mxu1 %v1598_v13  ;;  %v693_v10 = vperm.slane %v687_v8, 0  ;;  %v697_v11 = vperm.slane %v696_v9, 0  ;;  %v1628_v8 = vld [vmem:[%s2164_s6 + $0x2c] sm:$0xf0]  ;;  %v1624_v9 = vld [vmem:[%s2164_s6 + $0x14] sm:$0xf] }
  0x40   :  { %665 = vmatpush.bf16.msrb.mxu2 %v1606_v16 }
  0x41   :  { %678 = vmatpush.bf16.msrb.mxu3 %v1614_v17  ;;  %640 = vmatmul.bf16.vlgmr.msrb.gmra.mxu0 %v184_v18  ;;  %v1528_v17 = vld [vmem:[%s2164_s6 + $0x48] sm:$0xf] }
  0x42   :  { %653 = vmatmul.bf16.vlgmr.msrb.gmra.mxu1 %v185_v19  ;;  %824 = vmatpush.bf16.msra.mxu0 %v1449_v25  ;;  %v1635_v18 = vld [vmem:[%s2164_s6 + $0x64] sm:$0xf0]  ;;  %v1631_v19 = vld [vmem:[%s2164_s6 + $0x4c] sm:$0xf]  ;;  %v1634_v25 = vld [vmem:[%s2164_s6 + $0x5c] sm:$0xf0] }
  0x43   :  { %666 = vmatmul.bf16.vlgmr.msrb.gmra.mxu2 %v186_v20  ;;  %837 = vmatpush.bf16.msra.mxu1 %v1453_v29  ;;  %v1529_v20 = vor.u32 %v1635_v18, %v1528_v17  ;;  %v1521_v28 = vor.u32 %v1634_v25, %v1520_v24  ;;  %v1522_v29 = vld [vmem:[%s2164_s6 + $0x60] sm:$0xf0] }
  0x44   :  { %679 = vmatmul.bf16.vlgmr.msrb.gmra.mxu3 %v187_v21  ;;  %850 = vmatpush.bf16.msra.mxu2 %v1457_v30  ;;  %v1530_v21 = vld [vmem:[%s2164_s6 + $0x68] sm:$0xf0]  ;;  %v1525_v30 = vor.u32 %v1630_v26, %v1522_v29 }
  0x45   :  { %863 = vmatpush.bf16.msra.mxu3 %v1461_v34  ;;  %v1533_v22 = vor.u32 %v1631_v19, %v1530_v21  ;;  %v1496_v34 = vld [vmem:[%s2164_s6 + $0x8] sm:$0xf] }
  0x46   :  { %825 = vmatpush.bf16.msra.mxu0 %v1417_v38  ;;  %v1497_v38 = vor.u32 %v1627_v35, %v1496_v34 }
  0x47   :  { %838 = vmatpush.bf16.msra.mxu1 %v1421_v39  ;;  %v1498_v39 = vld [vmem:[%s2164_s6 + $0x28] sm:$0xf0] }
  0x48   :  { %851 = vmatpush.bf16.msra.mxu2 %v1425_v43  ;;  %v1501_v44 = vor.u32 %v1623_v36, %v1498_v39 }
  0x49   :  { %864 = vmatpush.bf16.msra.mxu3 %v1429_v46  ;;  %v1622_v46 = vld [vmem:[%s2164_s6 + $0x4] sm:$0xf] }
  0x4a   :  { %876 = vmatpush.bf16.msrb.mxu0 %v1465_v50  ;;  %v1493_v48 = vor.u32 %v1622_v46, %v1490_v47  ;;  %v1109_v46 = vld [vmem:[%s2166_s8] sm:$0xff] }
  0x4b   :  { %889 = vmatpush.bf16.msrb.mxu1 %v1469_v51  ;;  %v1544_v51 = vld [vmem:[%s2164_s6 + $0x58] sm:$0xf]  ;;  %v1110_v47 = vunpack.c.l.bf16 %v1109_v46 }
  0x4c   :  { %902 = vmatpush.bf16.msrb.mxu2 %v1473_v55  ;;  %v1545_v55 = vor.u32 %v1637_v52, %v1544_v51 }
  0x4d   :  { %915 = vmatpush.bf16.msrb.mxu3 %v1477_v59  ;;  %v1549_v59 = vor.u32 %v1633_v53, %v1546_v56  ;;  %v1116_v56 = vperm.slane %v1110_v47, 4 }
  0x4e   :  { %877 = vmatpush.bf16.msrb.mxu0 %v1433_v60  ;;  %v1537_v60 = vor.u32 %v1636_v58, %v1536_v57  ;;  %v1117_v57 = vperm.slane %v1110_v47, 6 }
  0x4f   :  { %890 = vmatpush.bf16.msrb.mxu1 %v1437_v0 }
  0x50   :  { %903 = vmatpush.bf16.msrb.mxu2 %v1441_v4  ;;  %v1514_v4 = vld [vmem:[%s2164_s6 + $0x38] sm:$0xf0]  ;;  %v1133_v61 = vperm.slane %v1117_v57, 0 }
  0x51   :  { %916 = vmatpush.bf16.msrb.mxu3 %v1445_v5  ;;  %v1513_v5 = vor.u32 %v1629_v2, %v1512_v63  ;;  %v1517_v6 = vor.u32 %v1625_v3, %v1514_v4 }
  0x78   :  { %v691_v12 = vpop.permute.xlu0 %690 }
  0x79   :  { %v694_v13 = vmul.f32 %v693_v10, %v691_v12  ;;  %v1505_v10 = vor.u32 %v1628_v8, %v1504_v7 }
  0x7b   :  { %v698_v14 = vadd.f32 %v697_v11, %v694_v13  ;;  %v1506_v11 = vld [vmem:[%s2164_s6 + $0x30] sm:$0xf0] }
  0x7c   :  { %v1509_v12 = vor.u32 %v1624_v9, %v1506_v11 }
  0x7d   :  { %v699_v15 = vmax.f32 %v698_v14, 0.0 }
  0x7f   :  { %v717_v16 = vpack.c.bf16 %v699_v15, %v699_v15 }
  0x81   :  { %1478 = vmatmul.msk.bf16.vlgmr.msra.gmra.mxu0 %vm814_vm0, %v717_v16  ;;  %1479 = vmatmul.msk.bf16.vlgmr.msra.gmra.mxu1 %vm814_vm0, %v717_v16 }
  0x82   :  { %1480 = vmatmul.msk.bf16.vlgmr.msra.gmra.mxu2 %vm814_vm0, %v717_v16  ;;  %1481 = vmatmul.msk.bf16.vlgmr.msra.gmra.mxu3 %vm814_vm0, %v717_v16 }
  0x83   :  { %1037 = vmatpush.bf16.msra.mxu2 %v1529_v20  ;;  %1050 = vmatpush.bf16.msra.mxu3 %v1533_v22 }
  0x84   :  { %1011 = vmatpush.bf16.msra.mxu0 %v1521_v28  ;;  %1024 = vmatpush.bf16.msra.mxu1 %v1525_v30 }
  0x87   :  { %1038 = vmatpush.bf16.msra.mxu2 %v1497_v38  ;;  %1051 = vmatpush.bf16.msra.mxu3 %v1501_v44 }
  0x88   :  { %1012 = vmatpush.bf16.msra.mxu0 %v1489_v45  ;;  %1025 = vmatpush.bf16.msra.mxu1 %v1493_v48  ;;  %v1114_v48 = vperm.slane %v1110_v47, 0 }
  0x91   :  { %1482 = vmatmul.msk.bf16.vlgmr.msrb.gmra.mxu0 %vm814_vm0, %v717_v16  ;;  %1483 = vmatmul.msk.bf16.vlgmr.msrb.gmra.mxu1 %vm814_vm0, %v717_v16 }
  0x92   :  { %1484 = vmatmul.msk.bf16.vlgmr.msrb.gmra.mxu2 %vm814_vm0, %v717_v16  ;;  %1485 = vmatmul.msk.bf16.vlgmr.msrb.gmra.mxu3 %vm814_vm0, %v717_v16 }
  0x93   :  { %1089 = vmatpush.bf16.msrb.mxu2 %v1545_v55  ;;  %1102 = vmatpush.bf16.msrb.mxu3 %v1549_v59 }
  0x94   :  { %1063 = vmatpush.bf16.msrb.mxu0 %v1537_v60  ;;  %1076 = vmatpush.bf16.msrb.mxu1 %v1541_v1  ;;  %v1132_v60 = vperm.slane %v1116_v56, 0 }
  0x97   :  { %1090 = vmatpush.bf16.msrb.mxu2 %v1513_v5  ;;  %1103 = vmatpush.bf16.msrb.mxu3 %v1517_v6 }
  0x98   :  { %1064 = vmatpush.bf16.msrb.mxu0 %v1505_v10  ;;  %1077 = vmatpush.bf16.msrb.mxu1 %v1509_v12 }
  0x9e   :  { %v589_v23 = vpop.f32.mrf.mxu0 }
  0x9f   :  { %v602_v27 = vpop.f32.mrf.mxu1  ;;  %v590_v0 = vadd.f32 %v589_v23, %v167_v49  ;;  %v1115_v49 = vperm.slane %v1110_v47, 2 }
  0xa1   :  { %v603_v13 = vadd.f32 %v602_v27, %v590_v0  ;;  %v1131_v51 = vperm.slane %v1115_v49, 0  ;;  %v1111_v0 = vunpack.c.h.bf16 %v1109_v46 }
  0xa3   :  { %v1118_v7 = vperm.slane %v1111_v0, 0  ;;  %v1119_v8 = vperm.slane %v1111_v0, 2 }
  0xa5   :  { %v1134_v11 = vperm.slane %v1118_v7, 0  ;;  %v1135_v12 = vperm.slane %v1119_v8, 0 }
  0xa6   :  { %v615_v32 = vpop.f32.mrf.mxu2  ;;  %v591_v37 = vpop.f32.mrf.mxu0 }
  0xa7   :  { %v628_v33 = vpop.f32.mrf.mxu3  ;;  %v604_v43 = vpop.f32.mrf.mxu1  ;;  %v616_v14 = vadd.f32 %v615_v32, %v603_v13 }
  0xa9   :  { %v629_v15 = vadd.f32 %v628_v33, %v616_v14 }
  0xae   :  { %v617_v50 = vpop.f32.mrf.mxu2 }
  0xaf   :  { %v630_v54 = vpop.f32.mrf.mxu3  ;;  %v1130_v50 = vperm.slane %v1114_v48, 0 }
  0xbe   :  { %v641_v16 = vpop.f32.mrf.mxu0 }
  0xbf   :  { %v654_v17 = vpop.f32.mrf.mxu1  ;;  %v642_v18 = vadd.f32 %v641_v16, %v629_v15 }
  0xc1   :  { %v655_v19 = vadd.f32 %v654_v17, %v642_v18  ;;  %v1120_v17 = vperm.slane %v1111_v0, 4  ;;  %v1121_v18 = vperm.slane %v1111_v0, 6 }
  0xc6   :  { %v667_v20 = vpop.f32.mrf.mxu2  ;;  %v643_v23 = vpop.f32.mrf.mxu0 }
  0xc7   :  { %v680_v21 = vpop.f32.mrf.mxu3  ;;  %v668_v22 = vadd.f32 %v667_v20, %v655_v19  ;;  %v656_v24 = vpop.f32.mrf.mxu1 }
  0xc9   :  { %v681_v25 = vadd.f32 %v680_v21, %v668_v22  ;;  %v1136_v21 = vperm.slane %v1120_v17, 0  ;;  %v1137_v22 = vperm.slane %v1121_v18, 0 }
  0xcb   :  { %v684_v26 = vmax.f32 %v681_v25, 0.0 }
  0xcd   :  { %v700_v28 = vpack.c.bf16 %v684_v26, %v684_v26 }
  0xce   :  { %v669_v29 = vpop.f32.mrf.mxu2 }
  0xcf   :  { %v682_v27 = vpop.f32.mrf.mxu3  ;;  %1550 = vmatmul.msk.bf16.vlgmr.msra.gmra.mxu0 %vm814_vm0, %v700_v28  ;;  %1551 = vmatmul.msk.bf16.vlgmr.msra.gmra.mxu1 %vm814_vm0, %v700_v28 }
  0xd0   :  { %1552 = vmatmul.msk.bf16.vlgmr.msra.gmra.mxu2 %vm814_vm0, %v700_v28  ;;  %1553 = vmatmul.msk.bf16.vlgmr.msra.gmra.mxu3 %vm814_vm0, %v700_v28 }
  0xdf   :  { %1554 = vmatmul.msk.bf16.vlgmr.msrb.gmra.mxu0 %vm814_vm0, %v700_v28  ;;  %1555 = vmatmul.msk.bf16.vlgmr.msrb.gmra.mxu1 %vm814_vm0, %v700_v28 }
  0xe0   :  { %1556 = vmatmul.msk.bf16.vlgmr.msrb.gmra.mxu2 %vm814_vm0, %v700_v28  ;;  %1557 = vmatmul.msk.bf16.vlgmr.msrb.gmra.mxu3 %vm814_vm0, %v700_v28 }
  0xfe   :  { %v827_v30 = vpop.f32.mrf.mxu0  ;;  %v840_v31 = vpop.f32.mrf.mxu1 }
 0x105   :  { %v853_v32 = vpop.f32.mrf.mxu2  ;;  %v866_v33 = vpop.f32.mrf.mxu3 }
 0x106   :  { %v829_v34 = vpop.f32.mrf.mxu0  ;;  %v842_v35 = vpop.f32.mrf.mxu1 }
 0x10d   :  { %v855_v36 = vpop.f32.mrf.mxu2  ;;  %v868_v37 = vpop.f32.mrf.mxu3 }
 0x10e   :  { %v879_v38 = vpop.f32.mrf.mxu0  ;;  %v892_v39 = vpop.f32.mrf.mxu1 }
 0x115   :  { %v905_v40 = vpop.f32.mrf.mxu2  ;;  %v918_v41 = vpop.f32.mrf.mxu3 }
 0x116   :  { %v881_v42 = vpop.f32.mrf.mxu0  ;;  %v894_v43 = vpop.f32.mrf.mxu1 }
 0x11d   :  { %v907_v44 = vpop.f32.mrf.mxu2  ;;  %v920_v45 = vpop.f32.mrf.mxu3 }
 0x14c   :  { %v1014_v52 = vpop.f32.mrf.mxu0  ;;  %v1027_v53 = vpop.f32.mrf.mxu1 }
 0x14d   :  { %v1015_v54 = vadd.f32 %v1014_v52, %v827_v30  ;;  %v1028_v55 = vadd.f32 %v1027_v53, %v840_v31 }
 0x14f   :  { %v1138_v58 = vadd.f32 %v1130_v50, %v1015_v54  ;;  %v1139_v59 = vadd.f32 %v1131_v51, %v1028_v55 }
 0x151   :  { %1146 = vst [vmem:[%s2167_s9] sm:$0xff] %v1138_v58 }
 0x152   :  { %1147 = vst [vmem:[%s2167_s9 + $0x8] sm:$0xff] %v1139_v59 }
 0x153   :  { %v1040_v62 = vpop.f32.mrf.mxu2  ;;  %v1053_v63 = vpop.f32.mrf.mxu3 }
 0x154   :  { %v1041_v1 = vadd.f32 %v1040_v62, %v853_v32  ;;  %v1054_v2 = vadd.f32 %v1053_v63, %v866_v33  ;;  %v1016_v3 = vpop.f32.mrf.mxu0  ;;  %v1029_v4 = vpop.f32.mrf.mxu1 }
 0x156   :  { %v1140_v5 = vadd.f32 %v1132_v60, %v1041_v1  ;;  %v1141_v6 = vadd.f32 %v1133_v61, %v1054_v2 }
 0x158   :  { %1148 = vst [vmem:[%s2167_s9 + $0x10] sm:$0xff] %v1140_v5 }
 0x159   :  { %1149 = vst [vmem:[%s2167_s9 + $0x18] sm:$0xff] %v1141_v6 }
 0x15b   :  { %v1042_v9 = vpop.f32.mrf.mxu2  ;;  %v1055_v10 = vpop.f32.mrf.mxu3 }
 0x15c   :  { %v1066_v13 = vpop.f32.mrf.mxu0  ;;  %v1079_v14 = vpop.f32.mrf.mxu1 }
 0x15d   :  { %v1067_v15 = vadd.f32 %v1066_v13, %v879_v38  ;;  %v1080_v16 = vadd.f32 %v1079_v14, %v892_v39 }
 0x15f   :  { %v1142_v19 = vadd.f32 %v1134_v11, %v1067_v15  ;;  %v1143_v20 = vadd.f32 %v1135_v12, %v1080_v16 }
 0x161   :  { %1150 = vst [vmem:[%s2167_s9 + $0x20] sm:$0xff] %v1142_v19 }
 0x162   :  { %1151 = vst [vmem:[%s2167_s9 + $0x28] sm:$0xff] %v1143_v20 }
 0x163   :  { %v1092_v23 = vpop.f32.mrf.mxu2  ;;  %v1105_v24 = vpop.f32.mrf.mxu3 }
 0x164   :  { %v1093_v25 = vadd.f32 %v1092_v23, %v905_v40  ;;  %v1106_v26 = vadd.f32 %v1105_v24, %v918_v41  ;;  %v1068_v28 = vpop.f32.mrf.mxu0  ;;  %v1081_v29 = vpop.f32.mrf.mxu1 }
 0x166   :  { %v1144_v27 = vadd.f32 %v1136_v21, %v1093_v25  ;;  %v1145_v30 = vadd.f32 %v1137_v22, %v1106_v26 }
 0x168   :  { %1152 = vst [vmem:[%s2167_s9 + $0x30] sm:$0xff] %v1144_v27 }
 0x169   :  { %1153 = vst [vmem:[%s2167_s9 + $0x38] sm:$0xff] %v1145_v30 }
 0x16b   :  { %v1094_v31 = vpop.f32.mrf.mxu2  ;;  %v1107_v32 = vpop.f32.mrf.mxu3 }

</bundles_post_ra>
